<compile_context>
chip_gen: v5e
topology: v5e:2x2
jax: 0.10.0
libtpu: 0.0.40
codegen_flags: <defaults>
</compile_context>

<pallas_src>
import jax
import jax.numpy as jnp
from jax.experimental import pallas as pl
from jax.experimental.pallas import tpu as pltpu

LANE = 128  # TPU lane width


# ----------------------------------------------------------------------------
# Kernel: one batch chunk per grid step
# ----------------------------------------------------------------------------
def _lstm_head_kernel(x_ref,                          # (Bc, T, F)        f32
                      wih0_ref, whh0_ref, b0_ref,     # (F,4H),(H,4H) bf16; (1,4H) f32
                      wih1_ref, whh1_ref, b1_ref,     # (H,4H),(H,4H) bf16; (1,4H) f32
                      fc1w_ref, fc1b_ref,             # (H,P)  bf16; (1,P) f32
                      fc2w_ref, fc2b_ref,             # (P,P)  bf16; (1,P) f32
                      out_ref):                       # (2, Bc, P)        f32
    Bc, T, _ = x_ref.shape
    H = whh0_ref.shape[0]

    # Weight tiles are VMEM-resident across the whole grid (constant index maps);
    # hoist the vreg loads out of the (unrolled) time loop.
    wih0, whh0, b0 = wih0_ref[...], whh0_ref[...], b0_ref[...]
    wih1, whh1, b1 = wih1_ref[...], whh1_ref[...], b1_ref[...]

    def cell(x_in, h, c, wih, whh, b):
        # gates: (Bc, 4H) with 4H == 128 -> a single lane-aligned MXU tile, no padding.
        gates = (jnp.dot(x_in, wih, preferred_element_type=jnp.float32)
                 + jnp.dot(h.astype(jnp.bfloat16), whh, preferred_element_type=jnp.float32)
                 + b)
        # Activations over the full 128-lane gates vreg, then 32-lane sub-slices.
        sig = jax.nn.sigmoid(gates)
        tnh = jnp.tanh(gates)
        i = sig[:, 0 * H:1 * H]     # PyTorch gate order: input, forget, cell(g), output
        f = sig[:, 1 * H:2 * H]
        g = tnh[:, 2 * H:3 * H]
        o = sig[:, 3 * H:4 * H]
        c_new = f * c + i * g
        return o * jnp.tanh(c_new), c_new

    h0 = c0 = h1 = c1 = jnp.zeros((Bc, H), jnp.float32)

    # T is static (== 1 for this module) -> straight-line code.
    # TODO(synk): for long sequences switch to lax.fori_loop(..., unroll=k) with
    # (h0, c0, h1, c1) as carries to avoid instruction-stream blowup.
    for t in range(T):
        x_t = x_ref[:, t, :].astype(jnp.bfloat16)           # (Bc, F), no lane padding
        h0, c0 = cell(x_t, h0, c0, wih0, whh0, b0)
        # TODO(synk): nn.LSTM inter-layer dropout (p=0.01) only acts in training mode;
        # eval-mode (identity) semantics are implemented here.
        h1, c1 = cell(h0.astype(jnp.bfloat16), h1, c1, wih1, whh1, b1)

    # Fused head over both layers' final hidden states, kept in vregs
    # (no VMEM scratch store->load roundtrip on the critical path).
    h_n = jnp.concatenate([h0, h1], axis=0).astype(jnp.bfloat16)     # (2Bc, H)
    z = jnp.dot(h_n, fc1w_ref[...], preferred_element_type=jnp.float32) + fc1b_ref[...]
    y = (jnp.dot(z.astype(jnp.bfloat16), fc2w_ref[...],
                 preferred_element_type=jnp.float32) + fc2b_ref[...])        # (2Bc, P)
    out_ref[0, :, :] = y[0:Bc, :]
    out_ref[1, :, :] = y[Bc:2 * Bc, :]


# ----------------------------------------------------------------------------
# Parameter packing (done once, outside the kernel)
# ----------------------------------------------------------------------------
def prepare_params(params, input_size):
    """Cast weights to bf16; only the tiny fc head is lane-padded (lane-dense output).
    No per-gate padding: 4*H is already a multiple of 128."""
    H = params["whh0_t"].shape[0]
    G = 4 * H
    assert G % LANE == 0, "pick hidden_size so 4*H is a multiple of 128"
    fc1_out = params["fc1w_t"].shape[1]
    out_size = params["fc2w_t"].shape[1]
    P = LANE
    assert fc1_out <= P and out_size <= P

    def pad2(a, rows, cols):
        return jnp.pad(a, ((0, rows - a.shape[0]), (0, cols - a.shape[1])))

    bf = jnp.bfloat16
    weights = dict(
        # LSTM weights in bf16 (half the DMA bytes, MXU-native input); biases stay f32
        # since they are added after the f32 accumulation.
        wih0=params["wih0_t"].astype(bf),                  # (F, 4H)
        whh0=params["whh0_t"].astype(bf),                  # (H, 4H)
        b0=params["b0"].astype(jnp.float32),               # (1, 4H)
        wih1=params["wih1_t"].astype(bf),                  # (H, 4H)
        whh1=params["whh1_t"].astype(bf),                  # (H, 4H)
        b1=params["b1"].astype(jnp.float32),               # (1, 4H)
        # Head padded to one 128-lane tile -> lane-dense (2B, 128) output slab.
        fc1w=pad2(params["fc1w_t"], H, P).astype(bf),      # (H, P)
        fc1b=pad2(params["fc1b"], 1, P).astype(jnp.float32),
        fc2w=pad2(params["fc2w_t"], P, P).astype(bf),      # (P, P)
        fc2b=pad2(params["fc2b"], 1, P).astype(jnp.float32),
    )
    meta = dict(H=H, G=G, P=P, out_size=out_size)
    return weights, meta


def lstm_model_forward(x_btf, weights, meta):
    """x_btf: (B, T, F) batch-first f32, like the PyTorch module after reshape."""
    B, T, F = x_btf.shape
    H, G, P, out_size = meta["H"], meta["G"], meta["P"], meta["out_size"]

    # Batch-chunk grid: weights use constant index maps so they are DMA'd into VMEM
    # once and stay resident across all grid steps while x/out pipeline per chunk.
    # The chunk axis is 'parallel' so the v7x megacore can shard it across both TCs.
    Bc = 8 if B % 8 == 0 else B
    grid = (B // Bc,)

    def const_spec(shape):
        return pl.BlockSpec(shape, lambda i, _s=shape: (0,) * len(_s))

    out = pl.pallas_call(
        _lstm_head_kernel,
        out_shape=jax.ShapeDtypeStruct((2, B, P), jnp.float32),
        grid=grid,
        in_specs=[
            pl.BlockSpec((Bc, T, F), lambda i: (i, 0, 0)),   # x, unpadded
            const_spec((F, G)), const_spec((H, G)), const_spec((1, G)),   # layer 0
            const_spec((H, G)), const_spec((H, G)), const_spec((1, G)),   # layer 1
            const_spec((H, P)), const_spec((1, P)),                        # fc1
            const_spec((P, P)), const_spec((1, P)),                        # fc2
        ],
        out_specs=pl.BlockSpec((2, Bc, P), lambda i: (0, i, 0)),
        compiler_params=pltpu.CompilerParams(dimension_semantics=("parallel",)),
    )(x_btf.astype(jnp.float32),
      weights["wih0"], weights["whh0"], weights["b0"],
      weights["wih1"], weights["whh1"], weights["b1"],
      weights["fc1w"], weights["fc1b"], weights["fc2w"], weights["fc2b"])

    # Strip lane padding -> (num_layers=2, B, out_size), exactly matching PyTorch
    # (h_n -> squeeze(0) is a no-op with 2 layers -> fc1 -> fc2).
    return out[:, :, :out_size]


# ----------------------------------------------------------------------------
# Deterministic PyTorch-style parameter init (weights stored pre-transposed)
# ----------------------------------------------------------------------------
def init_params(key, input_size, hidden_size, output_size):
    H = hidden_size
    ks = list(jax.random.split(key, 12))
    k_lstm = 1.0 / jnp.sqrt(H)

    def u(k, shape, bound):
        return jax.random.uniform(k, shape, jnp.float32, -bound, bound)

    return {
        # layer 0
        "wih0_t": u(ks[0], (input_size, 4 * H), k_lstm),
        "whh0_t": u(ks[1], (H, 4 * H), k_lstm),
        "b0": (u(ks[2], (1, 4 * H), k_lstm) + u(ks[3], (1, 4 * H), k_lstm)),
        # layer 1 (input is layer-0 hidden state)
        "wih1_t": u(ks[4], (H, 4 * H), k_lstm),
        "whh1_t": u(ks[5], (H, 4 * H), k_lstm),
        "b1": (u(ks[6], (1, 4 * H), k_lstm) + u(ks[7], (1, 4 * H), k_lstm)),
        # fc1: Linear(H, 10), fc2: Linear(10, output_size)
        "fc1w_t": u(ks[8], (H, 10), 1.0 / jnp.sqrt(H)),
        "fc1b": u(ks[9], (1, 10), 1.0 / jnp.sqrt(H)),
        "fc2w_t": u(ks[10], (10, output_size), 1.0 / jnp.sqrt(10.0)),
        "fc2b": u(ks[11], (1, output_size), 1.0 / jnp.sqrt(10.0)),
    }


def reference_forward(x_btf, params):
    """Pure-JAX f32 reference mirroring PyTorch eval-mode semantics (unpadded)."""
    B, T, F = x_btf.shape
    H = params["whh0_t"].shape[0]

    def cell(x_t, h, c, wih_t, whh_t, b):
        gates = x_t @ wih_t + h @ whh_t + b
        i = jax.nn.sigmoid(gates[:, 0 * H:1 * H])
        f = jax.nn.sigmoid(gates[:, 1 * H:2 * H])
        g = jnp.tanh(gates[:, 2 * H:3 * H])
        o = jax.nn.sigmoid(gates[:, 3 * H:4 * H])
        c = f * c + i * g
        return o * jnp.tanh(c), c

    h0 = c0 = h1 = c1 = jnp.zeros((B, H), jnp.float32)
    for t in range(T):
        h0, c0 = cell(x_btf[:, t, :], h0, c0,
                      params["wih0_t"], params["whh0_t"], params["b0"])
        h1, c1 = cell(h0, h1, c1,
                      params["wih1_t"], params["whh1_t"], params["b1"])
    h_n = jnp.stack([h0, h1], axis=0)                      # (2, B, H); squeeze(0) no-op
    z = h_n @ params["fc1w_t"] + params["fc1b"]            # (2, B, 10)
    return z @ params["fc2w_t"] + params["fc2b"]           # (2, B, 1)


if __name__ == "__main__":
    # Small shapes consistent with the module: original input (B, F) -> (B, 1, F).
    # hidden_size=32 so 4*H = 128 = one lane tile (module spec uses 100; kept small).
    B, F = 16, 16
    hidden_size = 32
    output_size = 1

    key = jax.random.PRNGKey(0)
    k_x, k_p = jax.random.split(key)

    input_tensor = jax.random.normal(k_x, (B, F), jnp.float32)
    # mirrors: input_tensor.reshape((N, 1, F)) with batch_first=True (seq_len = 1)
    x = input_tensor.reshape((B, 1, F))

    params = init_params(k_p, input_size=F, hidden_size=hidden_size,
                         output_size=output_size)
    weights, meta = prepare_params(params, input_size=F)

    out = lstm_model_forward(x, weights, meta)
    out = jax.block_until_ready(out)

    ref = reference_forward(x, params)
    assert out.shape == (2, B, output_size), out.shape
    # bf16 weight/activation matmul inputs with f32 accumulation -> loosened tolerance.
    max_err = float(jnp.max(jnp.abs(out - ref)))
    assert jnp.allclose(out, ref, atol=2e-2, rtol=2e-2), ("max_abs_err", max_err)

    print("KERNEL_OK")
</pallas_src>

<mosaic_0001>
module attributes {stable_mosaic.version = 11 : i64} {
  func.func @_lstm_head_kernel(%arg0: i32, %arg1: memref<8x1x16xf32, #tpu.memory_space<vmem>>, %arg2: memref<16x128xbf16, #tpu.memory_space<vmem>>, %arg3: memref<32x128xbf16, #tpu.memory_space<vmem>>, %arg4: memref<1x128xf32, #tpu.memory_space<vmem>>, %arg5: memref<32x128xbf16, #tpu.memory_space<vmem>>, %arg6: memref<32x128xbf16, #tpu.memory_space<vmem>>, %arg7: memref<1x128xf32, #tpu.memory_space<vmem>>, %arg8: memref<32x128xbf16, #tpu.memory_space<vmem>>, %arg9: memref<1x128xf32, #tpu.memory_space<vmem>>, %arg10: memref<128x128xbf16, #tpu.memory_space<vmem>>, %arg11: memref<1x128xf32, #tpu.memory_space<vmem>>, %arg12: memref<2x8x128xf32, #tpu.memory_space<vmem>>) attributes {dimension_semantics = [#tpu.dimension_semantics<parallel>], iteration_bounds = array<i64: 2>, scalar_prefetch = 0 : i64, scratch_operands = 0 : i64, tpu.core_type = #tpu.core_type<tc>, window_params = [{transform_indices = @transform_0, window_bounds = array<i64: 8, 1, 16>}, {pipeline_mode = #tpu.pipeline_mode<synchronous>, transform_indices = @transform_1, window_bounds = array<i64: 16, 128>}, {pipeline_mode = #tpu.pipeline_mode<synchronous>, transform_indices = @transform_2, window_bounds = array<i64: 32, 128>}, {pipeline_mode = #tpu.pipeline_mode<synchronous>, transform_indices = @transform_3, window_bounds = array<i64: 1, 128>}, {pipeline_mode = #tpu.pipeline_mode<synchronous>, transform_indices = @transform_4, window_bounds = array<i64: 32, 128>}, {pipeline_mode = #tpu.pipeline_mode<synchronous>, transform_indices = @transform_5, window_bounds = array<i64: 32, 128>}, {pipeline_mode = #tpu.pipeline_mode<synchronous>, transform_indices = @transform_6, window_bounds = array<i64: 1, 128>}, {pipeline_mode = #tpu.pipeline_mode<synchronous>, transform_indices = @transform_7, window_bounds = array<i64: 32, 128>}, {pipeline_mode = #tpu.pipeline_mode<synchronous>, transform_indices = @transform_8, window_bounds = array<i64: 1, 128>}, {pipeline_mode = #tpu.pipeline_mode<synchronous>, transform_indices = @transform_9, window_bounds = array<i64: 128, 128>}, {pipeline_mode = #tpu.pipeline_mode<synchronous>, transform_indices = @transform_10, window_bounds = array<i64: 1, 128>}, {transform_indices = @transform_11, window_bounds = array<i64: 2, 8, 128>}]} {
    %c0 = arith.constant 0 : index
    %c0_0 = arith.constant 0 : index
    %0 = vector.load %arg2[%c0, %c0_0] : memref<16x128xbf16, #tpu.memory_space<vmem>>, vector<16x128xbf16>
    %c0_1 = arith.constant 0 : index
    %c0_2 = arith.constant 0 : index
    %1 = vector.load %arg3[%c0_1, %c0_2] : memref<32x128xbf16, #tpu.memory_space<vmem>>, vector<32x128xbf16>
    %c0_3 = arith.constant 0 : index
    %c0_4 = arith.constant 0 : index
    %2 = vector.load %arg4[%c0_3, %c0_4] : memref<1x128xf32, #tpu.memory_space<vmem>>, vector<1x128xf32>
    %c0_5 = arith.constant 0 : index
    %c0_6 = arith.constant 0 : index
    %3 = vector.load %arg5[%c0_5, %c0_6] : memref<32x128xbf16, #tpu.memory_space<vmem>>, vector<32x128xbf16>
    %c0_7 = arith.constant 0 : index
    %c0_8 = arith.constant 0 : index
    %4 = vector.load %arg6[%c0_7, %c0_8] : memref<32x128xbf16, #tpu.memory_space<vmem>>, vector<32x128xbf16>
    %c0_9 = arith.constant 0 : index
    %c0_10 = arith.constant 0 : index
    %5 = vector.load %arg7[%c0_9, %c0_10] : memref<1x128xf32, #tpu.memory_space<vmem>>, vector<1x128xf32>
    %cst = arith.constant 0.000000e+00 : f32
    %6 = vector.broadcast %cst : f32 to vector<8x32xf32>
    %c0_11 = arith.constant 0 : index
    %c0_12 = arith.constant 0 : index
    %c0_13 = arith.constant 0 : index
    %7 = vector.load %arg1[%c0_11, %c0_12, %c0_13] : memref<8x1x16xf32, #tpu.memory_space<vmem>>, vector<8x1x16xf32>
    %8 = vector.shape_cast %7 : vector<8x1x16xf32> to vector<8x16xf32>
    %9 = arith.truncf %8 : vector<8x16xf32> to vector<8x16xbf16>
    %cst_14 = arith.constant dense<0.000000e+00> : vector<8x128xf32>
    %10 = tpu.matmul %9, %0, %cst_14 {dimension_numbers = #tpu.dot_dimension_numbers<[1], [0], [0], [1], [0, 0, 1, 1], [], []>} : vector<8x16xbf16>, vector<16x128xbf16>, vector<8x128xf32> -> vector<8x128xf32>
    %11 = arith.truncf %6 : vector<8x32xf32> to vector<8x32xbf16>
    %cst_15 = arith.constant dense<0.000000e+00> : vector<8x128xf32>
    %12 = tpu.matmul %11, %1, %cst_15 {dimension_numbers = #tpu.dot_dimension_numbers<[1], [0], [0], [1], [0, 0, 1, 1], [], []>} : vector<8x32xbf16>, vector<32x128xbf16>, vector<8x128xf32> -> vector<8x128xf32>
    %13 = arith.addf %10, %12 : vector<8x128xf32>
    %14 = vector.broadcast %2 : vector<1x128xf32> to vector<8x128xf32>
    %15 = arith.addf %13, %14 : vector<8x128xf32>
    %16 = arith.negf %15 : vector<8x128xf32>
    %17 = math.exp %16 : vector<8x128xf32>
    %cst_16 = arith.constant 1.000000e+00 : f32
    %18 = vector.broadcast %cst_16 : f32 to vector<8x128xf32>
    %19 = arith.addf %18, %17 : vector<8x128xf32>
    %20 = arith.divf %18, %19 : vector<8x128xf32>
    %21 = math.tanh %15 : vector<8x128xf32>
    %22 = vector.extract_strided_slice %20 {offsets = [0, 0], sizes = [8, 32], strides = [1, 1]} : vector<8x128xf32> to vector<8x32xf32>
    %23 = vector.extract_strided_slice %20 {offsets = [0, 32], sizes = [8, 32], strides = [1, 1]} : vector<8x128xf32> to vector<8x32xf32>
    %24 = vector.extract_strided_slice %21 {offsets = [0, 64], sizes = [8, 32], strides = [1, 1]} : vector<8x128xf32> to vector<8x32xf32>
    %25 = vector.extract_strided_slice %20 {offsets = [0, 96], sizes = [8, 32], strides = [1, 1]} : vector<8x128xf32> to vector<8x32xf32>
    %26 = arith.mulf %23, %6 : vector<8x32xf32>
    %27 = arith.mulf %22, %24 : vector<8x32xf32>
    %28 = arith.addf %26, %27 : vector<8x32xf32>
    %29 = math.tanh %28 : vector<8x32xf32>
    %30 = arith.mulf %25, %29 : vector<8x32xf32>
    %31 = arith.truncf %30 : vector<8x32xf32> to vector<8x32xbf16>
    %cst_17 = arith.constant dense<0.000000e+00> : vector<8x128xf32>
    %32 = tpu.matmul %31, %3, %cst_17 {dimension_numbers = #tpu.dot_dimension_numbers<[1], [0], [0], [1], [0, 0, 1, 1], [], []>} : vector<8x32xbf16>, vector<32x128xbf16>, vector<8x128xf32> -> vector<8x128xf32>
    %33 = arith.truncf %6 : vector<8x32xf32> to vector<8x32xbf16>
    %cst_18 = arith.constant dense<0.000000e+00> : vector<8x128xf32>
    %34 = tpu.matmul %33, %4, %cst_18 {dimension_numbers = #tpu.dot_dimension_numbers<[1], [0], [0], [1], [0, 0, 1, 1], [], []>} : vector<8x32xbf16>, vector<32x128xbf16>, vector<8x128xf32> -> vector<8x128xf32>
    %35 = arith.addf %32, %34 : vector<8x128xf32>
    %36 = vector.broadcast %5 : vector<1x128xf32> to vector<8x128xf32>
    %37 = arith.addf %35, %36 : vector<8x128xf32>
    %38 = arith.negf %37 : vector<8x128xf32>
    %39 = math.exp %38 : vector<8x128xf32>
    %cst_19 = arith.constant 1.000000e+00 : f32
    %40 = vector.broadcast %cst_19 : f32 to vector<8x128xf32>
    %41 = arith.addf %40, %39 : vector<8x128xf32>
    %42 = arith.divf %40, %41 : vector<8x128xf32>
    %43 = math.tanh %37 : vector<8x128xf32>
    %44 = vector.extract_strided_slice %42 {offsets = [0, 0], sizes = [8, 32], strides = [1, 1]} : vector<8x128xf32> to vector<8x32xf32>
    %45 = vector.extract_strided_slice %42 {offsets = [0, 32], sizes = [8, 32], strides = [1, 1]} : vector<8x128xf32> to vector<8x32xf32>
    %46 = vector.extract_strided_slice %43 {offsets = [0, 64], sizes = [8, 32], strides = [1, 1]} : vector<8x128xf32> to vector<8x32xf32>
    %47 = vector.extract_strided_slice %42 {offsets = [0, 96], sizes = [8, 32], strides = [1, 1]} : vector<8x128xf32> to vector<8x32xf32>
    %48 = arith.mulf %45, %6 : vector<8x32xf32>
    %49 = arith.mulf %44, %46 : vector<8x32xf32>
    %50 = arith.addf %48, %49 : vector<8x32xf32>
    %51 = math.tanh %50 : vector<8x32xf32>
    %52 = arith.mulf %47, %51 : vector<8x32xf32>
    %53 = tpu.concatenate %30, %52 in 0 : vector<8x32xf32>, vector<8x32xf32> -> vector<16x32xf32>
    %54 = arith.truncf %53 : vector<16x32xf32> to vector<16x32xbf16>
    %c0_20 = arith.constant 0 : index
    %c0_21 = arith.constant 0 : index
    %55 = vector.load %arg8[%c0_20, %c0_21] : memref<32x128xbf16, #tpu.memory_space<vmem>>, vector<32x128xbf16>
    %cst_22 = arith.constant dense<0.000000e+00> : vector<16x128xf32>
    %56 = tpu.matmul %54, %55, %cst_22 {dimension_numbers = #tpu.dot_dimension_numbers<[1], [0], [0], [1], [0, 0, 1, 1], [], []>} : vector<16x32xbf16>, vector<32x128xbf16>, vector<16x128xf32> -> vector<16x128xf32>
    %c0_23 = arith.constant 0 : index
    %c0_24 = arith.constant 0 : index
    %57 = vector.load %arg9[%c0_23, %c0_24] : memref<1x128xf32, #tpu.memory_space<vmem>>, vector<1x128xf32>
    %58 = vector.broadcast %57 : vector<1x128xf32> to vector<16x128xf32>
    %59 = arith.addf %56, %58 : vector<16x128xf32>
    %60 = arith.truncf %59 : vector<16x128xf32> to vector<16x128xbf16>
    %c0_25 = arith.constant 0 : index
    %c0_26 = arith.constant 0 : index
    %61 = vector.load %arg10[%c0_25, %c0_26] : memref<128x128xbf16, #tpu.memory_space<vmem>>, vector<128x128xbf16>
    %cst_27 = arith.constant dense<0.000000e+00> : vector<16x128xf32>
    %62 = tpu.matmul %60, %61, %cst_27 {dimension_numbers = #tpu.dot_dimension_numbers<[1], [0], [0], [1], [0, 0, 1, 1], [], []>} : vector<16x128xbf16>, vector<128x128xbf16>, vector<16x128xf32> -> vector<16x128xf32>
    %c0_28 = arith.constant 0 : index
    %c0_29 = arith.constant 0 : index
    %63 = vector.load %arg11[%c0_28, %c0_29] : memref<1x128xf32, #tpu.memory_space<vmem>>, vector<1x128xf32>
    %64 = vector.broadcast %63 : vector<1x128xf32> to vector<16x128xf32>
    %65 = arith.addf %62, %64 : vector<16x128xf32>
    %66 = vector.extract_strided_slice %65 {offsets = [0, 0], sizes = [8, 128], strides = [1, 1]} : vector<16x128xf32> to vector<8x128xf32>
    %c0_30 = arith.constant 0 : index
    %c0_31 = arith.constant 0 : index
    %c0_32 = arith.constant 0 : index
    %67 = vector.load %arg12[%c0_30, %c0_31, %c0_32] : memref<2x8x128xf32, #tpu.memory_space<vmem>>, vector<1x8x128xf32>
    %68 = vector.shape_cast %67 : vector<1x8x128xf32> to vector<8x128xf32>
    %69 = vector.shape_cast %66 : vector<8x128xf32> to vector<1x8x128xf32>
    tpu.vector_store %arg12[%c0_30, %c0_31, %c0_32], %69 {strides = array<i32>} : memref<2x8x128xf32, #tpu.memory_space<vmem>>, vector<1x8x128xf32>,
    %70 = vector.extract_strided_slice %65 {offsets = [8, 0], sizes = [8, 128], strides = [1, 1]} : vector<16x128xf32> to vector<8x128xf32>
    %c1 = arith.constant 1 : index
    %c0_33 = arith.constant 0 : index
    %c0_34 = arith.constant 0 : index
    %71 = vector.load %arg12[%c1, %c0_33, %c0_34] : memref<2x8x128xf32, #tpu.memory_space<vmem>>, vector<1x8x128xf32>
    %72 = vector.shape_cast %71 : vector<1x8x128xf32> to vector<8x128xf32>
    %73 = vector.shape_cast %70 : vector<8x128xf32> to vector<1x8x128xf32>
    tpu.vector_store %arg12[%c1, %c0_33, %c0_34], %73 {strides = array<i32>} : memref<2x8x128xf32, #tpu.memory_space<vmem>>, vector<1x8x128xf32>,
    return
  }
  func.func @transform_0(%arg0: i32) -> (i32, i32, i32) {
    %c0_i32 = arith.constant 0 : i32
    %c0_i32_0 = arith.constant 0 : i32
    %c0_i32_1 = arith.constant 0 : i32
    return %arg0, %c0_i32, %c0_i32_0 : i32, i32, i32
  }
  func.func @transform_1(%arg0: i32) -> (i32, i32) {
    %c0_i32 = arith.constant 0 : i32
    %c0_i32_0 = arith.constant 0 : i32
    %c0_i32_1 = arith.constant 0 : i32
    return %c0_i32, %c0_i32_0 : i32, i32
  }
  func.func @transform_2(%arg0: i32) -> (i32, i32) {
    %c0_i32 = arith.constant 0 : i32
    %c0_i32_0 = arith.constant 0 : i32
    %c0_i32_1 = arith.constant 0 : i32
    return %c0_i32, %c0_i32_0 : i32, i32
  }
  func.func @transform_3(%arg0: i32) -> (i32, i32) {
    %c0_i32 = arith.constant 0 : i32
    %c0_i32_0 = arith.constant 0 : i32
    %c0_i32_1 = arith.constant 0 : i32
    return %c0_i32, %c0_i32_0 : i32, i32
  }
  func.func @transform_4(%arg0: i32) -> (i32, i32) {
    %c0_i32 = arith.constant 0 : i32
    %c0_i32_0 = arith.constant 0 : i32
    %c0_i32_1 = arith.constant 0 : i32
    return %c0_i32, %c0_i32_0 : i32, i32
  }
  func.func @transform_5(%arg0: i32) -> (i32, i32) {
    %c0_i32 = arith.constant 0 : i32
    %c0_i32_0 = arith.constant 0 : i32
    %c0_i32_1 = arith.constant 0 : i32
    return %c0_i32, %c0_i32_0 : i32, i32
  }
  func.func @transform_6(%arg0: i32) -> (i32, i32) {
    %c0_i32 = arith.constant 0 : i32
    %c0_i32_0 = arith.constant 0 : i32
    %c0_i32_1 = arith.constant 0 : i32
    return %c0_i32, %c0_i32_0 : i32, i32
  }
  func.func @transform_7(%arg0: i32) -> (i32, i32) {
    %c0_i32 = arith.constant 0 : i32
    %c0_i32_0 = arith.constant 0 : i32
    %c0_i32_1 = arith.constant 0 : i32
    return %c0_i32, %c0_i32_0 : i32, i32
  }
  func.func @transform_8(%arg0: i32) -> (i32, i32) {
    %c0_i32 = arith.constant 0 : i32
    %c0_i32_0 = arith.constant 0 : i32
    %c0_i32_1 = arith.constant 0 : i32
    return %c0_i32, %c0_i32_0 : i32, i32
  }
  func.func @transform_9(%arg0: i32) -> (i32, i32) {
    %c0_i32 = arith.constant 0 : i32
    %c0_i32_0 = arith.constant 0 : i32
    %c0_i32_1 = arith.constant 0 : i32
    return %c0_i32, %c0_i32_0 : i32, i32
  }
  func.func @transform_10(%arg0: i32) -> (i32, i32) {
    %c0_i32 = arith.constant 0 : i32
    %c0_i32_0 = arith.constant 0 : i32
    %c0_i32_1 = arith.constant 0 : i32
    return %c0_i32, %c0_i32_0 : i32, i32
  }
  func.func @transform_11(%arg0: i32) -> (i32, i32, i32) {
    %c0_i32 = arith.constant 0 : i32
    %c0_i32_0 = arith.constant 0 : i32
    %c0_i32_1 = arith.constant 0 : i32
    return %c0_i32, %arg0, %c0_i32_0 : i32, i32, i32
  }
}

</mosaic_0001>

<bundles_post_ra>
// kernel: tpu_custom_call.1
= control target key start
LH: loop header
LB: loop body
LE: loop exit
PB: predicated region body
PF: predicated region fallthrough
CT: control target
= control target key end

     0   :  { %s1883_s0 = inlined_call_operand.hbm [shape: f32[16,1,16], index: 0, kind: input, shape index: {}]   ;;  %s1884_s1 = inlined_call_operand.hbm [shape: bf16[16,128], index: 1, kind: input, shape index: {}]   ;;  %s1885_s2 = inlined_call_operand.hbm [shape: bf16[32,128], index: 2, kind: input, shape index: {}]   ;;  %s1886_s3 = inlined_call_operand.vmem [shape: f32[1,128], index: 3, kind: input, shape index: {}]   ;;  %s1887_s4 = inlined_call_operand.hbm [shape: bf16[32,128], index: 4, kind: input, shape index: {}]   ;;  %s1888_s5 = inlined_call_operand.hbm [shape: bf16[32,128], index: 5, kind: input, shape index: {}]   ;;  %s1889_s6 = inlined_call_operand.vmem [shape: f32[1,128], index: 6, kind: input, shape index: {}]   ;;  %s1890_s7 = inlined_call_operand.hbm [shape: bf16[32,128], index: 7, kind: input, shape index: {}]   ;;  %s1891_s8 = inlined_call_operand.vmem [shape: f32[1,128], index: 8, kind: input, shape index: {}]   ;;  %s1892_s9 = inlined_call_operand.hbm [shape: bf16[128,128], index: 9, kind: input, shape index: {}]   ;;  %s1893_s10 = inlined_call_operand.vmem [shape: f32[1,128], index: 10, kind: input, shape index: {}]   ;;  %s1894_s11 = inlined_call_operand.hbm [shape: f32[2,16,128], index: 11, kind: output, shape index: {}]  }
   0x1   :  { %1895 = sst [smem:[#allocation20_spill]] %s1884_s1 }
   0x2   :  { %1896 = sst [smem:[#allocation21_spill]] %s1885_s2 }
   0x3   :  { %1897 = sst [smem:[#allocation22_spill]] %s1887_s4 }
   0x4   :  { %1898 = sst [smem:[#allocation23_spill]] %s1888_s5 }
   0x5   :  { %1899 = sst [smem:[#allocation24_spill]] %s1890_s7 }
   0x6   :  { %1900 = sst [smem:[#allocation25_spill]] %s1892_s9 }
   0x7   :  { %16 = vsyncpa [#allocation3], 0 }
   0x8   :  { %18 = vsyncpa [#allocation3 + $0x1], 0 }
   0x9   :  { %19 = vsyncpa [#allocation6], 0 }
   0xa   :  { %20 = vsyncpa [#allocation9], 0 }
   0xb   :  { %21 = vsyncpa [#allocation12], 0 }
   0xc   :  { %22 = vsyncpa [#allocation4], 0 }
   0xd   :  { %24 = vsyncpa [#allocation4 + $0x1], 0  ;;  %s1658_s17 = smov 0   ;;  %s1660_s18 = smov 0  }
   0xe   :  { %s1662_s19 = smov 0   ;;  %s1664_s20 = smov 0  }
   0xf LB: > { %s1901_s1 = sld [smem:[#allocation20_spill]]  ;;  %s1682_s24 = sadd.s32 4294967295, %s1580_s20   ;;  %s1580_s20 = sphi %s1664_s20, %s1918_s20   ;;  %s1576_s19 = sphi %s1662_s19, %s1917_s19   ;;  %s1572_s18 = sphi %s1660_s18, %s1916_s18   ;;  %s1568_s17 = sphi %s1658_s17, %s1915_s17  }
  0x10   : > { %p1041_p0 = scmp.ge.s32.totalorder %s1580_s20, 1  ;;  %p51_p1 = scmp.eq.s32.totalorder %s1682_s24, 0 }
  0x11   : > { %p297_p2 = scmp.lt.s32.totalorder %s1580_s20, 3  ;;  %s1582_s26 = smov [#allocation5]  }
  0x12   : > { %s310_s27 = sshll.u32 %s1582_s26, 4  ;;  %s1903_s4 = sld [smem:[#allocation22_spill]]  ;;  %s311_s27 = int_to_ptr.vmem [resolvable:$true] %s310_s27 }
  0x13   : > { %p1687_p3 = pnand %p1041_p0, %p297_p2  ;;  %s1905_s7 = sld [smem:[#allocation24_spill]] }
  0x14   : > { %s1583_s16 = smov [#allocation8]   ;;  %s1584_s22 = smov 64  }
  0x15   : > { %s308_s23 = sshll.u32 %s1901_s1, 4  ;;  %p1183_p4 = pneg %p1687_p3  ;;  %s309_s23 = int_to_ptr.hbm [resolvable:$true] %s308_s23 }
  0x16   : > { %s341_s21 = sshll.u32 %s1583_s16, 4  ;;  %s1585_s26 = smov 4   ;;  %s342_s21 = int_to_ptr.vmem [resolvable:$true] %s341_s21 }
  0x17   : > { %p1699_p6 = pnand %p1183_p4, %p51_p1  ;;  %s1906_s2 = sld [smem:[#allocation21_spill]] }
  0x18   : > { %s339_s30 = sshll.u32 %s1903_s4, 4  ;;  %s1586_s14 = smov [#allocation11]   ;;  %s340_s30 = int_to_ptr.hbm [resolvable:$true] %s339_s30 }
  0x19   : > { %s370_s15 = sshll.u32 %s1905_s7, 4  ;;  %s372_s16 = sshll.u32 %s1586_s14, 4  ;;  %s371_s15 = int_to_ptr.hbm [resolvable:$true] %s370_s15  ;;  %s373_s16 = int_to_ptr.vmem [resolvable:$true] %s372_s16 }
  0x1a   : > { %1186 = dma.hbm_to_vmem [thread:$0]  (!%p1699_p6), %s309_s23, 128, %s311_s27, [#allocation6], %s1584_s22, %s1584_s22, %s1585_s26  }
  0x1b   : > { %1192 = dma.hbm_to_vmem [thread:$0]  (!%p1699_p6), %s340_s30, 256, %s342_s21, [#allocation9], %s1584_s22, %s1584_s22, %s1585_s26  }
  0x1c   : > { %1198 = dma.hbm_to_vmem [thread:$0]  (!%p1699_p6), %s371_s15, 256, %s373_s16, [#allocation12], %s1584_s22, %s1584_s22, %s1585_s26  }
  0x1d   : > { %s322_s13 = sshll.u32 %s1906_s2, 4  ;;  %s1587_s23 = smov [#allocation7]   ;;  %s323_s13 = int_to_ptr.hbm [resolvable:$true] %s322_s13 }
  0x1e   : > { %s324_s27 = sshll.u32 %s1587_s23, 4  ;;  %s1907_s5 = sld [smem:[#allocation23_spill]]  ;;  %s325_s27 = int_to_ptr.vmem [resolvable:$true] %s324_s27 }
  0x1f   : > { %1189 = dma.hbm_to_vmem [thread:$0]  (!%p1699_p6), %s323_s13, 256, %s325_s27, [#allocation6], %s1584_s22, %s1584_s22, %s1585_s26  }
  0x20   : > { %s1908_s9 = sld [smem:[#allocation25_spill]]  ;;  %s1588_s14 = smov [#allocation10]  }
  0x21   : > { %s355_s1 = sshll.u32 %s1588_s14, 4  ;;  %s1589_s13 = smov [#allocation13]   ;;  %s356_s1 = int_to_ptr.vmem [resolvable:$true] %s355_s1 }
  0x22   : > { %s389_s16 = sshll.u32 %s1589_s13, 4  ;;  %s1040_s23 = sadd.s32 4294967294, %s1580_s20   ;;  %s390_s16 = int_to_ptr.vmem [resolvable:$true] %s389_s16 }
  0x23   : > { %s1747_s27 = sadd.s32 1, %s1580_s20   ;;  %s37_s28 = sadd.s32 1, %s1576_s19 }
  0x24   : > { %s353_s21 = sshll.u32 %s1907_s5, 4  ;;  %s34_s30 = ssub.s32 %s1580_s20, %s1747_s27  ;;  %s354_s21 = int_to_ptr.hbm [resolvable:$true] %s353_s21 }
  0x25   : > { %1195 = dma.hbm_to_vmem [thread:$0]  (!%p1699_p6), %s354_s21, 256, %s356_s1, [#allocation9], %s1584_s22, %s1584_s22, %s1585_s26  }
  0x26   : > { %s387_s29 = sshll.u32 %s1908_s9, 4  ;;  %p35_p7 = scmp.eq.s32.totalorder %s34_s30, 0  ;;  %s388_s29 = int_to_ptr.hbm [resolvable:$true] %s387_s29 }
  0x27   : > { %1201 = dma.hbm_to_vmem [thread:$0]  (!%p1699_p6), %s388_s29, 1024, %s390_s16, [#allocation12], %s1584_s22, %s1584_s22, %s1585_s26  }
  0x28   : > { %p44_p8 = scmp.ne.s32.totalorder %s1576_s19, %s1572_s18  ;;  %p45_p9 = scmp.eq.s32.totalorder %s1580_s20, 0 }
  0x29   : > { %p50_p10 = scmp.ne.s32.totalorder %s1572_s18, %s1568_s17  ;;  %p284_p13 = scmp.eq.s32.totalorder %s1682_s24, 1 }
  0x2a   : > { %s1758_s21 = scalar_select %p35_p7, %s1576_s19, %s37_s28  }
  0x2b   : > { %p1760_p11 = por %p45_p9, %p44_p8  ;;  %p1766_p12 = por %p51_p1, %p50_p10 }
  0x2c   : > { %p290_p0 = scmp.eq.s32.totalorder %s1040_s23, 1  ;;  %p1216_p2 = scmp.lt.s32.totalorder %s1580_s20, 2 }
  0x2d   : > { %s406_s26 = sand.u32 1, %s1576_s19   ;;  %p1773_p4 = por %p284_p13, %p44_p8 }
  0x2e   : > { %p1777_p6 = por %p290_p0, %p50_p10  ;;  %s1049_s14 = sshll.u32 %s406_s26, 3 }
  0x2f   : > { %s1050_s1 = sshll.u32 %s1580_s20, 3  ;;  %s410_s28 = scalar_lea.vmem [#allocation2], %s1049_s14 }
  0x30   : > { %s414_s30 = scalar_lea.hbm %s1883_s0, %s1050_s1  ;;  %s417_s2 = sshll.u32 %s410_s28, 4  ;;  %s418_s2 = int_to_ptr.vmem [resolvable:$true] %s417_s2 }
  0x31   : > { %s415_s4 = sshll.u32 %s414_s30, 4  ;;  %p1787_p7 = pnand %p1216_p2, %p1760_p11  ;;  %s416_s4 = int_to_ptr.hbm [resolvable:$true] %s415_s4 }
  0x32   : > { %s407_s5 = scalar_lea.sflag [#allocation3], %s406_s26  ;;  %s1472_s7 = sshra.s32 %s416_s4, 4  ;;  %s1473_s7 = int_to_ptr.hbm [resolvable:$true] %s1472_s7 }
  0x33   : > { %s1474_s9 = scalar_lea.hbm %s1473_s7, 8  ;;  %p1476_p9 = pneg %p1787_p7 }
  0x34   : > { %p1475_p8 = scmp.ne.s32.totalorder %s1473_s7, %s1474_s9  ;;  %s1479_s13 = scalar_lea.hbm %s1883_s0, 16 }
  0x35   : > { %p1480_p11 = scmp.lt.s32.totalorder %s1473_s7, %s1883_s0  ;;  %p1481_p0 = scmp.lt.s32.totalorder %s1479_s13, %s1474_s9 }
  0x36   : > { %p1477_p10 = pnand %p1476_p9, %p1475_p8 }
  0x37   : > { %p1482_p2 = por %p1481_p0, %p1480_p11 }
  0x38   : > { %p1478_p13 = pneg %p1477_p10 }
  0x3a   : > { %p1483_p5 = pnand %p1482_p2, %p1478_p13 }
  0x3c   : > { %1486 = shalt.err (!%p1483_p5)
}
  0x3d   : > { %s1590_s26 = smov 16   ;;  %s1591_s30 = smov 1  }
  0x3e   : > { %1205 = dma.hbm_to_vmem [thread:$0]  (!%p1787_p7), %s416_s4, 128, %s418_s2, %s407_s5, %s1590_s26, %s1590_s26, %s1591_s30  }
  0x3f   : > { %429 = sbr.rel (%p1687_p3) target bundleno = 1554 (0x612), region = 64  ;;  %s1804_s28 = sand.u32 (!%p1687_p3), 1, %s1572_s18  }
  0x40   : > { %s1052_s14 = sshll.u32 (!%p1687_p3), %s1804_s28, 3  ;;  %s432_s7 = scalar_lea.sflag (!%p1687_p3), [#allocation3], %s1804_s28 }
  0x41   : > { %s435_s9 = scalar_lea.vmem (!%p1687_p3), [#allocation2], %s1052_s14 }
  0x44   : > { %1547 = dma.done.wait (%p1766_p12), %s432_s7, 128  }
  0x45   : > { %1549 = vsyncadd (%p1766_p12), %s432_s7, 4294967168 }
  0x46   : > { %1551 = dma.done.wait (%p51_p1), [#allocation6], 384  }
  0x47   : > { %1553 = vsyncadd (%p51_p1), [#allocation6], 4294966912 }
  0x48   : > { %1555 = dma.done.wait (%p51_p1), [#allocation9], 512  }
  0x49   : > { %1557 = vsyncadd (%p51_p1), [#allocation9], 4294966784 }
  0x4a   : > { %1559 = dma.done.wait (%p51_p1), [#allocation12], 1280  }
  0x4b   : > { %1561 = vsyncadd (%p51_p1), [#allocation12], 4294966016  ;;  %v1140_v0 = vld [vmem:[#allocation7 + $0x8] sm:$0xff]  ;;  %v1139_v1 = vld [vmem:[#allocation7] sm:$0xff]  ;;  %vm585_vm0 = vcmask 1041409   ;;  %vm588_vm1 = vcmask 1042434  }
  0x4c   : > { %v1138_v2 = vld [vmem:[#allocation5] sm:$0xff]  ;;  %v523_v3 = vld [vmem:[%s435_s9] sm:$0x1]  ;;  %v524_v4 = vld [vmem:[%s435_s9 + $0x1] sm:$0x1]  ;;  %561 = vmatpush.bf16.msra.mxu2 %v1140_v0  ;;  %vm591_vm2 = vcmask 1043459  }
  0x4d   : > { %v525_v5 = vld [vmem:[%s435_s9 + $0x2] sm:$0x1]  ;;  %623 = vmatpush.bf16.msra.mxu1 %v1138_v2  ;;  %v526_v6 = vld [vmem:[%s435_s9 + $0x3] sm:$0x1]  ;;  %v527_v7 = vld [vmem:[%s435_s9 + $0x4] sm:$0x1]  ;;  %v531_v9 = vpack.c.bf16 %v523_v3, %v523_v3  ;;  %v532_v10 = vpack.c.bf16 %v524_v4, %v524_v4 }
  0x4e   : > { %v528_v8 = vld [vmem:[%s435_s9 + $0x5] sm:$0x1]  ;;  %v533_v11 = vpack.c.bf16 %v525_v5, %v525_v5  ;;  %v529_v12 = vld [vmem:[%s435_s9 + $0x6] sm:$0x1]  ;;  %v530_v13 = vld [vmem:[%s435_s9 + $0x7] sm:$0x1]  ;;  %v534_v14 = vpack.c.bf16 %v526_v6, %v526_v6  ;;  %v535_v15 = vpack.c.bf16 %v527_v7, %v527_v7 }
  0x4f   : > { %v536_v16 = vpack.c.bf16 %v528_v8, %v528_v8  ;;  %v537_v17 = vpack.c.bf16 %v529_v12, %v529_v12  ;;  %v538_v18 = vpack.c.bf16 %v530_v13, %v530_v13  ;;  %v576_v19 = vunpack.c.l.b16 %v531_v9  ;;  %v1272_v44 = vld [vmem:[%s1886_s3] ss:$0 sm:$0xff]  ;;  %s1593_s5 = smov 64   ;;  %s1594_s25 = smov 32   ;;  %v1142_v7 = vld [vmem:[#allocation8 + $0x8] sm:$0xff]  ;;  %v1143_v8 = vld [vmem:[#allocation10] sm:$0xff] }
  0x50   : > { %v577_v20 = vunpack.c.l.b16 %v532_v10  ;;  %v578_v21 = vunpack.c.l.b16 %v533_v11  ;;  %v579_v22 = vunpack.c.l.b16 %v534_v14  ;;  %v580_v23 = vunpack.c.l.b16 %v535_v15  ;;  %562 = vmatpush.bf16.msra.mxu2 %v1139_v1  ;;  %v1144_v6 = vld [vmem:[#allocation10 + $0x8] sm:$0xff]  ;;  %720 = vmatpush.bf16.msra.mxu3 %v1142_v7  ;;  %v1141_v9 = vld [vmem:[#allocation8] sm:$0xff]  ;;  %s1059_s16 = sshll.u32 %s1804_s28, 4  ;;  %s1135_s30 = sshll.u32 %s1682_s24, 3 }
  0x51   : > { %v581_v24 = vunpack.c.l.b16 %v536_v16  ;;  %v582_v25 = vunpack.c.l.b16 %v537_v17  ;;  %v583_v26 = vunpack.c.l.b16 %v538_v18  ;;  %vm594_vm3 = vcmask 1044484   ;;  %v1273_v16 = vld [vmem:[%s1889_s6] ss:$0 sm:$0xff]  ;;  %s906_s9 = scalar_lea.hbm %s1894_s11, %s1135_s30  ;;  %s504_s2 = scalar_lea.vmem [#allocation14], %s1059_s16 }
  0x52   : > { %v584_v27 = vrot.slane %v577_v20, 7  ;;  %v587_v28 = vrot.slane %v578_v21, 6  ;;  %v590_v29 = vrot.slane %v579_v22, 5  ;;  %v593_v30 = vrot.slane %v580_v23, 4  ;;  %s907_s4 = sshll.u32 %s504_s2, 4  ;;  %s1522_s13 = scalar_lea.hbm %s1894_s11, 32  ;;  %s908_s4 = int_to_ptr.vmem [resolvable:$true] %s907_s4 }
  0x53   : > { %v596_v32 = vrot.slane %v581_v24, 3  ;;  %v1592_v33 = vmov 0   ;;  %vm597_vm4 = vcmask 1045509   ;;  %v599_v35 = vrot.slane %v582_v25, 2 }
  0x54   : > { %v586_v31 = vsel %vm585_vm0, %v584_v27, %v576_v19  ;;  %563 = vmatmul.bf16.vlgmr.msra.gmra.mxu2 %v1592_v33  ;;  %vm600_vm5 = vcmask 1046534   ;;  %v602_v37 = vrot.slane %v583_v26, 1  ;;  %vm603_vm6 = vcmask 1047559   ;;  %721 = vmatpush.bf16.msra.mxu3 %v1141_v9 }
  0x55   : > { %v589_v34 = vsel %vm588_vm1, %v587_v28, %v586_v31  ;;  %vm612_vm7 = vcmask 130048   ;;  %689 = vmatpush.bf16.msrb.mxu2 %v1144_v6  ;;  %vm551_vm12 = vcmask 261120  }
  0x56   : > { %v592_v36 = vsel %vm591_vm2, %v590_v29, %v589_v34 }
  0x57   : > { %v595_v38 = vsel %vm594_vm3, %v593_v30, %v592_v36 }
  0x58   : > { %v598_v39 = vsel %vm597_vm4, %v596_v32, %v595_v38 }
  0x59   : > { %v601_v40 = vsel %vm600_vm5, %v599_v35, %v598_v39  ;;  %690 = vmatpush.bf16.msrb.mxu2 %v1143_v8 }
  0x5a   : > { %v604_v41 = vsel %vm603_vm6, %v602_v37, %v601_v40 }
  0x5b   : > { %v605_v42 = vpack.c.b16 %v604_v41, %v604_v41  ;;  %v1146_v41 = vld [vmem:[#allocation11 + $0x8] sm:$0xff] }
  0x5c   : > { %801 = vmatpush.bf16.msrb.mxu1 %v1146_v41 }
  0x5d   : > { %1072 = vmatmul.msk.bf16.vlgmr.msra.gmra.mxu1 %vm612_vm7, %v605_v42  ;;  %v1145_v42 = vld [vmem:[#allocation11] sm:$0xff] }
  0x60   : > { %802 = vmatpush.bf16.msrb.mxu1 %v1145_v42 }
  0x64   : > { %691 = vmatmul.bf16.vlgmr.msrb.gmra.mxu2 %v1592_v33 }
  0xd7   : > { %v564_v43 = vpop.f32.mrf.mxu2 }
  0xda   : > { %v625_v45 = vpop.f32.mrf.mxu1 }
  0xdb   : > { %v626_v46 = vadd.f32 %v625_v45, %v564_v43 }
  0xdd   : > { %v632_v47 = vadd.f32 %v1272_v44, %v626_v46  ;;  %v1154_v46 = vld [vmem:[#allocation13 + $0x38] sm:$0xff] }
  0xde   : > { %878 = vmatpush.bf16.msra.mxu0 %v1154_v46 }
  0xdf   : > { %1276 = vtanh.f32 %v632_v47  ;;  %v566_v48 = vpop.f32.mrf.mxu2  ;;  %v1073_v51 = vmul.f32 -1.442695, %v632_v47  ;;  %v1153_v47 = vld [vmem:[#allocation13 + $0x30] sm:$0xff] }
  0xe0   : > { %v1152_v48 = vld [vmem:[#allocation13 + $0x28] sm:$0xff] }
  0xe1   : > { %1278 = vpow2.f32 %v1073_v51 }
  0xe2   : > { %v627_v49 = vpop.f32.mrf.mxu1  ;;  %879 = vmatpush.bf16.msra.mxu0 %v1153_v47 }
  0xe3   : > { %v1151_v49 = vld [vmem:[#allocation13 + $0x20] sm:$0xff] }
  0xe5   : > { %v1277_v50 = vpop.eup %1276 }
  0xe6   : > { %655 = vrot.lane.b32.xlu0 %v1277_v50, %s1593_s5  ;;  %880 = vmatpush.bf16.msra.mxu0 %v1152_v48  ;;  %v1150_v50 = vld [vmem:[#allocation13 + $0x18] sm:$0xff] }
  0xe7   : > { %v1279_v52 = vpop.eup %1278  ;;  %v692_v13 = vpop.f32.mrf.mxu2 }
  0xe8   : > { %v636_v53 = vadd.f32 1.0, %v1279_v52  ;;  %v1149_v52 = vld [vmem:[#allocation13 + $0x10] sm:$0xff] }
  0xea   : > { %1280 = vrcp.f32 %v636_v53  ;;  %v648_v59 = vand.u32 2147483648, %v636_v53  ;;  %vm642_vm9 = vweird.f32 %v636_v53  ;;  %v646_v60 = vand.u32 2147483647, %v636_v53  ;;  %881 = vmatpush.bf16.msra.mxu0 %v1151_v49 }
  0xec   : > { %v649_v62 = vor.u32 1.1754944e-38, %v648_v59  ;;  %vm647_vm11 = vcmp.eq.f32.partialorder %v646_v60, 8.507059e+37 }
  0xee   : > { %882 = vmatpush.bf16.msra.mxu0 %v1150_v50 }
  0xef   : > { %v694_v15 = vpop.f32.mrf.mxu2 }
  0xf0   : > { %v1281_v54 = vpop.eup %1280 }
  0xf1   : > { %v638_v55 = vmul.f32 %v1281_v54, %v636_v53  ;;  %vm643_vm8 = vweird.f32 %v1281_v54  ;;  %v1148_v53 = vld [vmem:[#allocation13 + $0x8] sm:$0xff] }
  0xf2   : > { %vm644_vm10 = vmor %vm642_vm9, %vm643_vm8  ;;  %883 = vmatpush.bf16.msra.mxu0 %v1149_v52 }
  0xf3   : > { %v639_v56 = vsub.f32 1.0, %v638_v55 }
  0xf5   : > { %v640_v57 = vmul.f32 %v1281_v54, %v639_v56  ;;  %v1274_v56 = vld [vmem:[%s1891_s8] ss:$0 sm:$0xff] }
  0xf6   : > { %884 = vmatpush.bf16.msra.mxu0 %v1148_v53 }
  0xf7   : > { %v641_v58 = vadd.f32 %v1281_v54, %v640_v57 }
  0xf9   : > { %v645_v61 = vsel %vm644_vm10, %v1281_v54, %v641_v58  ;;  %v1147_v54 = vld [vmem:[#allocation13] sm:$0xff] }
  0xfa   : > { %v650_v0 = vsel %vm647_vm11, %v649_v62, %v645_v61  ;;  %885 = vmatpush.bf16.msra.mxu0 %v1147_v54  ;;  %v1275_v61 = vld [vmem:[%s1893_s10] ss:$0 sm:$0xff] }
  0xfb   : > { %v653_v2 = vmul.f32 0.0, %v650_v0 }
 0x158   : > { %v656_v63 = vpop.permute.xlu0 %655 }
 0x159   : > { %v658_v1 = vmul.f32 %v656_v63, %v650_v0 }
 0x15b   : > { %660 = vrot.lane.b32.xlu0 %v658_v1, %s1594_s25 }
 0x1cd   : > { %v661_v3 = vpop.permute.xlu0 %660 }
 0x1ce   : > { %v663_v4 = vadd.f32 %v661_v3, %v653_v2 }
 0x1d0   : > { %1282 = vtanh.f32 %v663_v4 }
 0x1d6   : > { %v1283_v5 = vpop.eup %1282 }
 0x1d7   : > { %666 = vrot.lane.b32.xlu1 %v1283_v5, %s1593_s5 }
 0x249   : > { %v667_v10 = vpop.permute.xlu1 %666 }
 0x24a   : > { %v669_v11 = vmul.f32 %v667_v10, %v650_v0 }
 0x24c   : > { %v670_v12 = vpack.c.bf16 %v669_v11, %v669_v11 }
 0x24e   : > { %697 = vrot.lane.b32.xlu1 %v670_v12, %s1594_s25 }
 0x2c0   : > { %v698_v14 = vpop.permute.xlu1 %697 }
 0x2c1   : > { %1090 = vmatmul.msk.bf16.vlgmr.msra.gmra.mxu3 %vm551_vm12, %v698_v14 }
 0x344   : > { %v723_v17 = vpop.f32.mrf.mxu3 }
 0x345   : > { %v724_v18 = vadd.f32 %v723_v17, %v692_v13 }
 0x347   : > { %v730_v19 = vadd.f32 %v1273_v16, %v724_v18 }
 0x349   : > { %1284 = vtanh.f32 %v730_v19  ;;  %v1091_v22 = vmul.f32 -1.442695, %v730_v19 }
 0x34b   : > { %1286 = vpow2.f32 %v1091_v22 }
 0x34c   : > { %v725_v20 = vpop.f32.mrf.mxu3 }
 0x34f   : > { %v1285_v21 = vpop.eup %1284 }
 0x350   : > { %753 = vrot.lane.b32.xlu2 %v1285_v21, %s1593_s5 }
 0x351   : > { %v1287_v23 = vpop.eup %1286 }
 0x352   : > { %v734_v24 = vadd.f32 1.0, %v1287_v23 }
 0x354   : > { %1288 = vrcp.f32 %v734_v24  ;;  %v746_v30 = vand.u32 2147483648, %v734_v24  ;;  %vm740_vm14 = vweird.f32 %v734_v24  ;;  %v744_v31 = vand.u32 2147483647, %v734_v24 }
 0x356   : > { %v747_v33 = vor.u32 1.1754944e-38, %v746_v30  ;;  %vm745_vm0 = vcmp.eq.f32.partialorder %v744_v31, 8.507059e+37 }
 0x35a   : > { %v1289_v25 = vpop.eup %1288 }
 0x35b   : > { %v736_v26 = vmul.f32 %v1289_v25, %v734_v24  ;;  %vm741_vm13 = vweird.f32 %v1289_v25 }
 0x35c   : > { %vm742_vm15 = vmor %vm740_vm14, %vm741_vm13 }
 0x35d   : > { %v737_v27 = vsub.f32 1.0, %v736_v26 }
 0x35f   : > { %v738_v28 = vmul.f32 %v1289_v25, %v737_v27 }
 0x361   : > { %v739_v29 = vadd.f32 %v1289_v25, %v738_v28 }
 0x363   : > { %v743_v32 = vsel %vm742_vm15, %v1289_v25, %v739_v29 }
 0x364   : > { %v748_v35 = vsel %vm745_vm0, %v747_v33, %v743_v32 }
 0x365   : > { %v751_v37 = vmul.f32 0.0, %v748_v35 }
 0x3aa   : > { %v754_v34 = vpop.permute.xlu2 %753 }
 0x3ab   : > { %v756_v36 = vmul.f32 %v754_v34, %v748_v35 }
 0x3ad   : > { %758 = vrot.lane.b32.xlu2 %v756_v36, %s1594_s25 }
 0x407   : > { %v759_v38 = vpop.permute.xlu2 %758 }
 0x408   : > { %v761_v39 = vadd.f32 %v759_v38, %v751_v37 }
 0x40a   : > { %1290 = vtanh.f32 %v761_v39 }
 0x410   : > { %v1291_v40 = vpop.eup %1290 }
 0x411   : > { %764 = vrot.lane.b32.xlu0 %v1291_v40, %s1593_s5  ;;  %s909_s5 = sshll.u32 %s906_s9, 4  ;;  %s910_s5 = int_to_ptr.hbm [resolvable:$true] %s909_s5 }
 0x412   : > { %s1516_s22 = sshra.s32 %s910_s5, 4  ;;  %s1517_s22 = int_to_ptr.hbm [resolvable:$true] %s1516_s22 }
 0x413   : > { %s1518_s24 = scalar_lea.hbm %s1517_s22, 16  ;;  %p1523_p12 = scmp.lt.s32.totalorder %s1517_s22, %s1894_s11 }
 0x414   : > { %p1519_p1 = scmp.ne.s32.totalorder %s1517_s22, %s1518_s24  ;;  %p1524_p7 = scmp.lt.s32.totalorder %s1522_s13, %s1518_s24 }
 0x416   : > { %p1520_p3 = pnand %p1519_p1, %p1773_p4  ;;  %p1525_p8 = por %p1524_p7, %p1523_p12 }
 0x418   : > { %p1521_p5 = pneg %p1520_p3 }
 0x41a   : > { %p1526_p9 = pnand %p1525_p8, %p1521_p5 }
 0x483   : > { %v765_v43 = vpop.permute.xlu0 %764 }
 0x484   : > { %v767_v44 = vmul.f32 %v765_v43, %v748_v35 }
 0x486   : > { %v768_v45 = vpack.c.bf16 %v767_v44, %v669_v11 }
 0x488   : > { %778 = vrot.lane.b32.xlu1 %v768_v45, %s1594_s25  ;;  %s896_s25 = scalar_lea.sflag [#allocation4], %s1804_s28 }
 0x4fa   : > { %v779_v51 = vpop.permute.xlu1 %778 }
 0x4fb   : > { %1100 = vmatmul.msk.bf16.vlgmr.msrb.gmra.mxu1 %vm551_vm12, %v779_v51 }
 0x578   : > { %v804_v55 = vpop.f32.mrf.mxu1 }
 0x579   : > { %v805_v58 = vadd.f32 %v1274_v56, %v804_v55 }
 0x580   : > { %v806_v57 = vpop.f32.mrf.mxu1 }
 0x581   : > { %v807_v59 = vadd.f32 %v1274_v56, %v806_v57 }
 0x583   : > { %v809_v60 = vpack.c.bf16 %v807_v59, %v805_v58 }
 0x585   : > { %886 = vmatmul.bf16.vlgmr.msra.gmra.mxu0 %v809_v60 }
 0x602   : > { %v887_v62 = vpop.f32.mrf.mxu0 }
 0x603   : > { %v888_v63 = vadd.f32 %v1275_v61, %v887_v62 }
 0x605   : > { %892 = vst [vmem:[%s504_s2] sm:$0xff] %v888_v63 }
 0x60a   : > { %v889_v0 = vpop.f32.mrf.mxu0 }
 0x60b   : > { %v890_v1 = vadd.f32 %v1275_v61, %v889_v0 }
 0x60d   : > { %1133 = vst [vmem:[%s504_s2 + $0x8] sm:$0xff] %v890_v1 }
 0x60e   : > { %1529 = shalt.err (!%p1526_p9)
}
 0x60f   : > { %s1595_s28 = smov 128   ;;  %s1596_s26 = smov 256  }
 0x610   : > { %s1597_s30 = smov 8  }
 0x611   : > { %1181 = dma.vmem_to_hbm [thread:$0]  (%p1773_p4), %s908_s4, 256, %s910_s5, %s896_s25, %s1595_s28, %s1596_s26, %s1597_s30  }
 0x612 PF: > { %s924_s14 = sand.u32 1, %s1568_s17   ;;  %p1914_p10 = scmp.ge.s32.totalorder %s1580_s20, 2 }
 0x613   : > { %s925_s7 = scalar_lea.sflag [#allocation4], %s924_s14 }
 0x614   : > { %p1207_p13 = pnand %p1914_p10, %p1777_p6 }
 0x616   : > { %p1208_p11 = pneg %p1207_p13 }
 0x618   : > { %1563 = dma.done.wait (%p1208_p11), %s925_s7, 256  }
 0x619   : > { %1565 = vsyncadd (%p1208_p11), %s925_s7, 4294967040  ;;  %p27_p0 = scmp.ge.s32.totalorder %s1747_s27, 4   ;;  %s1915_s17 = smov %s1572_s18 }
 0x61a   : > { %s1916_s18 = smov %s1576_s19  ;;  %s1917_s19 = smov %s1758_s21 }
 0x61b   : > { %s1918_s20 = smov %s1747_s27  ;;  %29 = sbr.rel (!%p27_p0) target bundleno = 15 (0xf), region = 134 }
 0x620   :  { %931 = vsyncpa [#allocation3], 1 }
 0x621   :  { %933 = vsyncpa [#allocation3 + $0x1], 1 }
 0x622   :  { %934 = vsyncpa [#allocation6], 1 }
 0x623   :  { %935 = vsyncpa [#allocation9], 1 }
 0x624   :  { %936 = vsyncpa [#allocation12], 1 }
 0x625   :  { %937 = vsyncpa [#allocation4], 1 }
 0x626   :  { %939 = vsyncpa [#allocation4 + $0x1], 1 }

</bundles_post_ra>
